<compile_context>
chip_gen: v7x
topology: tpu7x:2x2x1
jax: 0.10.0
libtpu: 0.0.40
codegen_flags: <defaults>
</compile_context>

<pallas_src>
import jax
import jax.numpy as jnp
from jax import lax
from jax.experimental import pallas as pl
from jax.experimental.pallas import tpu as pltpu


def _downsample_gemm_kernel(tap_ref, w_ref, b_ref, o_ref):
    """One MXU GEMM per M tile: (tm, 9*Cin) @ (9*Cin, Coutp) + bias."""
    acc = jnp.dot(tap_ref[...], w_ref[...], preferred_element_type=jnp.float32)
    o_ref[...] = (acc + b_ref[...]).astype(o_ref.dtype)


def _round_up(x, m):
    return ((x + m - 1) // m) * m


def timestep_embed_downsample(x, emb, context, weight, bias, *, padding=1,
                              tm=512, compute_dtype=jnp.bfloat16):
    """Forward pass of TimestepEmbedDownsample.

    x:       (N, C_in, H, W)  (PyTorch NCHW convention)
    weight:  (C_out, C_in, 3, 3)  (PyTorch OIHW convention)
    bias:    (C_out,)
    emb / context are ignored by the forward pass (as in the PyTorch module).
    Returns: (N, C_out, OH, OW) with OH = OW = floor((H + 2p - 3)/2) + 1.
    """
    del emb, context  # unused by the module's forward
    N, Cin, H, W = x.shape
    assert Cin == weight.shape[1]
    Cout = weight.shape[0]
    KH = KW = 3
    stride = 2
    OH = (H + 2 * padding - KH) // stride + 1
    OW = (W + 2 * padding - KW) // stride + 1
    M = N * OH * OW
    K9 = KH * KW * Cin

    # ---- glue (plain JAX): NCHW -> NHWC, zero-pad, im2col with the 9 taps
    # folded into the GEMM contraction dimension -----------------------------
    x_nhwc = jnp.transpose(x, (0, 2, 3, 1))
    xp = jnp.pad(x_nhwc,
                 ((0, 0), (padding, padding), (padding, padding), (0, 0)))
    taps = []
    for kh in range(KH):
        for kw in range(KW):
            t = xp[:, kh:kh + stride * OH:stride,
                      kw:kw + stride * OW:stride, :]        # (N, OH, OW, Cin)
            taps.append(t)
    taps = jnp.concatenate(taps, axis=-1).reshape(M, K9)    # (M, 9*Cin)
    taps = taps.astype(compute_dtype)

    # weight (Cout, Cin, kh, kw) -> (kh, kw, Cin, Cout) -> (9*Cin, Cout);
    # row ordering matches the tap concatenation above.
    w2 = jnp.transpose(weight, (2, 3, 1, 0)).reshape(K9, Cout)

    # Lane-dense output: pad a small Cout up to 128 lanes (zero weights/bias).
    Coutp = Cout if Cout >= 128 else 128
    if Coutp != Cout:
        w2 = jnp.pad(w2, ((0, 0), (0, Coutp - Cout)))
        b2 = jnp.pad(bias, (0, Coutp - Cout)).reshape(1, Coutp)
    else:
        b2 = bias.reshape(1, Coutp)
    w2 = w2.astype(compute_dtype)
    b2 = b2.astype(jnp.float32)

    # ---- M tiling -----------------------------------------------------------
    tm = max(8, min(tm, _round_up(M, 8)))   # multiple of 8, capped by problem
    m_pad = _round_up(M, tm)
    if m_pad != M:
        taps = jnp.pad(taps, ((0, m_pad - M), (0, 0)))
    grid = (m_pad // tm,)

    tap_bytes = taps.dtype.itemsize
    out_bytes = jnp.dtype(x.dtype).itemsize
    cost = pl.CostEstimate(
        flops=2 * m_pad * K9 * Coutp,
        transcendentals=0,
        bytes_accessed=int(taps.size * tap_bytes + w2.size * tap_bytes
                           + b2.size * 4 + m_pad * Coutp * out_bytes),
    )

    # Resident weights/bias + double-buffered tap & output tiles.
    vmem_need = (2 * tm * K9 * tap_bytes + K9 * Coutp * tap_bytes
                 + Coutp * 4 + 2 * tm * Coutp * out_bytes)
    vmem_limit = None
    if vmem_need > 16 * 1024 * 1024:
        vmem_limit = int(min(vmem_need * 5 // 4 + (4 << 20), 100 << 20))

    out_flat = pl.pallas_call(
        _downsample_gemm_kernel,
        out_shape=jax.ShapeDtypeStruct((m_pad, Coutp), x.dtype),
        grid_spec=pltpu.PrefetchScalarGridSpec(
            num_scalar_prefetch=0,
            grid=grid,
            in_specs=[
                pl.BlockSpec((tm, K9), lambda i: (i, 0)),     # tap tile
                pl.BlockSpec((K9, Coutp), lambda i: (0, 0)),  # resident weight
                pl.BlockSpec((1, Coutp), lambda i: (0, 0)),   # resident bias
            ],
            out_specs=pl.BlockSpec((tm, Coutp), lambda i: (i, 0)),
        ),
        compiler_params=pltpu.CompilerParams(
            dimension_semantics=("parallel",),
            vmem_limit_bytes=vmem_limit),
        cost_estimate=cost,
    )(taps, w2, b2)

    out = out_flat[:M, :Cout].reshape(N, OH, OW, Cout)
    return jnp.transpose(out, (0, 3, 1, 2))                  # back to NCHW


if __name__ == "__main__":
    key = jax.random.PRNGKey(0)
    kx, ke, kc, kw, kb = jax.random.split(key, 5)

    # Small shapes consistent with the module: channels=4, out_channels=8
    N, C, H, W = 2, 4, 16, 16
    Cout = 8
    x = jax.random.normal(kx, (N, C, H, W), jnp.float32)
    emb = jax.random.normal(ke, (N, 32), jnp.float32)         # ignored by forward
    context = jax.random.normal(kc, (N, 8, 32), jnp.float32)  # ignored by forward

    # Deterministic synthetic parameters (nn.Conv2d(C, Cout, 3, stride=2, padding=1))
    weight = 0.1 * jax.random.normal(kw, (Cout, C, 3, 3), jnp.float32)
    bias = 0.1 * jax.random.normal(kb, (Cout,), jnp.float32)

    # Reference: XLA conv (matches PyTorch Conv2d semantics, NCHW/OIHW)
    ref = lax.conv_general_dilated(
        x, weight, window_strides=(2, 2), padding=((1, 1), (1, 1)),
        dimension_numbers=("NCHW", "OIHW", "NCHW")) + bias.reshape(1, -1, 1, 1)

    # Exact-precision path (f32 operands on the MXU).
    out_f32 = timestep_embed_downsample(x, emb, context, weight, bias,
                                        compute_dtype=jnp.float32)
    out_f32 = jax.block_until_ready(out_f32)
    assert out_f32.shape == (N, Cout, H // 2, W // 2), out_f32.shape
    assert jnp.allclose(out_f32, ref, atol=1e-4, rtol=1e-4), \
        float(jnp.max(jnp.abs(out_f32 - ref)))

    # Default fast path (bf16 operands, f32 MXU accumulation).
    out_bf16 = timestep_embed_downsample(x, emb, context, weight, bias)
    out_bf16 = jax.block_until_ready(out_bf16)
    assert out_bf16.shape == (N, Cout, H // 2, W // 2), out_bf16.shape
    assert jnp.allclose(out_bf16, ref, atol=5e-2, rtol=5e-2), \
        float(jnp.max(jnp.abs(out_bf16 - ref)))

    print("KERNEL_OK")
</pallas_src>

<mosaic_0001>
module attributes {stable_mosaic.version = 11 : i64} {
  func.func @_downsample_gemm_kernel(%arg0: i32, %arg1: memref<128x36xf32, #tpu.memory_space<vmem>>, %arg2: memref<36x128xf32, #tpu.memory_space<vmem>>, %arg3: memref<1x128xf32, #tpu.memory_space<vmem>>, %arg4: memref<128x128xf32, #tpu.memory_space<vmem>>) attributes {dimension_semantics = [#tpu.dimension_semantics<parallel>], iteration_bounds = array<i64: 1>, scalar_prefetch = 0 : i64, scratch_operands = 0 : i64, tpu.core_type = #tpu.core_type<tc>, window_params = [{transform_indices = @transform_0, window_bounds = array<i64: 128, 36>}, {pipeline_mode = #tpu.pipeline_mode<synchronous>, transform_indices = @transform_1, window_bounds = array<i64: 36, 128>}, {pipeline_mode = #tpu.pipeline_mode<synchronous>, transform_indices = @transform_2, window_bounds = array<i64: 1, 128>}, {transform_indices = @transform_3, window_bounds = array<i64: 128, 128>}]} {
    %c0 = arith.constant 0 : index
    %c0_0 = arith.constant 0 : index
    %0 = vector.load %arg1[%c0, %c0_0] : memref<128x36xf32, #tpu.memory_space<vmem>>, vector<128x36xf32>
    %c0_1 = arith.constant 0 : index
    %c0_2 = arith.constant 0 : index
    %1 = vector.load %arg2[%c0_1, %c0_2] : memref<36x128xf32, #tpu.memory_space<vmem>>, vector<36x128xf32>
    %cst = arith.constant dense<0.000000e+00> : vector<128x128xf32>
    %2 = tpu.matmul %0, %1, %cst {dimension_numbers = #tpu.dot_dimension_numbers<[1], [0], [0], [1], [0, 0, 1, 1], [], []>} : vector<128x36xf32>, vector<36x128xf32>, vector<128x128xf32> -> vector<128x128xf32>
    %c0_3 = arith.constant 0 : index
    %c0_4 = arith.constant 0 : index
    %3 = vector.load %arg3[%c0_3, %c0_4] : memref<1x128xf32, #tpu.memory_space<vmem>>, vector<1x128xf32>
    %4 = vector.broadcast %3 : vector<1x128xf32> to vector<128x128xf32>
    %5 = arith.addf %2, %4 : vector<128x128xf32>
    %c0_5 = arith.constant 0 : index
    %c0_6 = arith.constant 0 : index
    %6 = vector.load %arg4[%c0_5, %c0_6] : memref<128x128xf32, #tpu.memory_space<vmem>>, vector<128x128xf32>
    tpu.vector_store %arg4[%c0_5, %c0_6], %5 {strides = array<i32>} : memref<128x128xf32, #tpu.memory_space<vmem>>, vector<128x128xf32>,
    return
  }
  func.func @transform_0(%arg0: i32) -> (i32, i32) {
    %c0_i32 = arith.constant 0 : i32
    %c0_i32_0 = arith.constant 0 : i32
    return %arg0, %c0_i32 : i32, i32
  }
  func.func @transform_1(%arg0: i32) -> (i32, i32) {
    %c0_i32 = arith.constant 0 : i32
    %c0_i32_0 = arith.constant 0 : i32
    %c0_i32_1 = arith.constant 0 : i32
    return %c0_i32, %c0_i32_0 : i32, i32
  }
  func.func @transform_2(%arg0: i32) -> (i32, i32) {
    %c0_i32 = arith.constant 0 : i32
    %c0_i32_0 = arith.constant 0 : i32
    %c0_i32_1 = arith.constant 0 : i32
    return %c0_i32, %c0_i32_0 : i32, i32
  }
  func.func @transform_3(%arg0: i32) -> (i32, i32) {
    %c0_i32 = arith.constant 0 : i32
    %c0_i32_0 = arith.constant 0 : i32
    return %arg0, %c0_i32 : i32, i32
  }
}

</mosaic_0001>

<bundles_post_ra>
// kernel: tpu_custom_call.1
= control target key start
LH: loop header
LB: loop body
LE: loop exit
PB: predicated region body
PF: predicated region fallthrough
CT: control target
= control target key end

     0   :  { %vm43_vm0 = vcmask 293888   ;;  %vm92_vm1 = vcmask 1043456   ;;  %s504_s0 = inlined_call_operand.vmem [shape: f32[128,36], index: 0, kind: input, shape index: {}]   ;;  %s505_s1 = inlined_call_operand.vmem [shape: f32[36,128], index: 1, kind: input, shape index: {}]   ;;  %s506_s2 = inlined_call_operand.vmem [shape: f32[1,128], index: 2, kind: input, shape index: {}]   ;;  %s507_s3 = inlined_call_operand.hbm [shape: f32[128,128], index: 3, kind: output, shape index: {}]  }
   0x1   :  { %v31_v0 = vld [vmem:[%s505_s1] sm:$0xff]  ;;  %v32_v1 = vld [vmem:[%s505_s1 + $0x8] sm:$0xff]  ;;  %v33_v2 = vld [vmem:[%s505_s1 + $0x10] sm:$0xff] }
   0x2   :  { %v346_v3 = vpack.c.bf16 %v32_v1, %v31_v0  ;;  %v34_v4 = vld [vmem:[%s505_s1 + $0x18] sm:$0xff]  ;;  %v15_v5 = vld [vmem:[%s504_s0] sm:$0xff] }
   0x3   :  { %v350_v6 = vpack.c.bf16 %v34_v4, %v33_v2  ;;  %322 = vmatprep.mubr.msk.f32.mxu0 %vm43_vm0, %v15_v5  ;;  %v23_v7 = vld [vmem:[%s504_s0 + $0x40] sm:$0xff] }
   0x4   :  { %347 = vmatprep.subr.bf16.mxu0 %v346_v3  ;;  %354 = vmatprep.subr.bf16.mxu1 %v346_v3  ;;  %v35_v8 = vld [vmem:[%s505_s1 + $0x20] sm:$0xf] }
   0x5   :  { %349 = vmatpush3.bf16.msra.mxu0 %v346_v3  ;;  %357 = vmatpush3.bf16.msra.mxu1 %v346_v3 }
   0x6   :  { %351 = vmatprep.subr.bf16.mxu0 %v350_v6  ;;  %355 = vmatprep.subr.bf16.mxu1 %v350_v6 }
   0x7   :  { %334 = vmatprep.mubr.msk.f32.mxu1 %vm43_vm0, %v23_v7 }
   0x8   :  { %8 = vsyncpa [#allocation3], 0  ;;  %v16_v9 = vld [vmem:[%s504_s0 + $0x8] sm:$0xff]  ;;  %v17_v11 = vld [vmem:[%s504_s0 + $0x10] sm:$0xff] }
   0x9   :  { %353 = vmatpush3.bf16.msra.mxu0 %v350_v6  ;;  %358 = vmatpush3.bf16.msra.mxu1 %v350_v6  ;;  %v24_v10 = vld [vmem:[%s504_s0 + $0x48] sm:$0xff]  ;;  %v25_v12 = vld [vmem:[%s504_s0 + $0x50] sm:$0xff]  ;;  %v18_v13 = vld [vmem:[%s504_s0 + $0x18] sm:$0xff] }
   0xa   :  { %320 = vmatprep.subr.msk.mxu0 %vm92_vm1, %v35_v8  ;;  %356 = vmatprep.subr.msk.mxu1 %vm92_vm1, %v35_v8  ;;  %v26_v14 = vld [vmem:[%s504_s0 + $0x58] sm:$0xff]  ;;  %v19_v15 = vld [vmem:[%s504_s0 + $0x20] sm:$0xff]  ;;  %v20_v17 = vld [vmem:[%s504_s0 + $0x28] sm:$0xff] }
   0xb   :  { %v27_v16 = vld [vmem:[%s504_s0 + $0x60] sm:$0xff]  ;;  %v28_v18 = vld [vmem:[%s504_s0 + $0x68] sm:$0xff]  ;;  %v21_v19 = vld [vmem:[%s504_s0 + $0x30] sm:$0xff] }
   0xc   :  { %v29_v20 = vld [vmem:[%s504_s0 + $0x70] sm:$0xff]  ;;  %v22_v21 = vld [vmem:[%s504_s0 + $0x38] sm:$0xff]  ;;  %v273_v23 = vld [vmem:[%s506_s2] ss:$0 sm:$0xff] }
   0xd   :  { %321 = vmatpush3.msk.msra.mxu0 %vm92_vm1, %v35_v8  ;;  %359 = vmatpush3.msk.msra.mxu1 %vm92_vm1, %v35_v8  ;;  %v30_v22 = vld [vmem:[%s504_s0 + $0x78] sm:$0xff]  ;;  %s387_s0 = smov [#allocation2]  }
   0xe   :  { %323 = vmatmul.mubr.msk.f32.vlgmr.msra.gmra.mrb[0].mxu0 %vm43_vm0, %v16_v9  ;;  %335 = vmatmul.mubr.msk.f32.vlgmr.msra.gmra.mrb[0].mxu1 %vm43_vm0, %v24_v10  ;;  %s262_s2 = sshll.u32 %s387_s0, 4  ;;  %s263_s2 = int_to_ptr.vmem [resolvable:$true] %s262_s2 }
   0xf   :  { %325 = vmatprep.mubr.msk.f32.mxu0 %vm43_vm0, %v17_v11  ;;  %337 = vmatprep.mubr.msk.f32.mxu1 %vm43_vm0, %v25_v12  ;;  %s363_s28 = scalar_lea.vmem %s263_s2, 2048  ;;  %p368_p1 = scmp.lt.s32.totalorder %s263_s2, %s263_s2 }
  0x10   :  { %p364_p0 = scmp.ne.s32.totalorder %s263_s2, %s363_s28  ;;  %p369_p2 = scmp.lt.s32.totalorder %s363_s28, %s363_s28 }
  0x12   :  { %326 = vmatmul.mubr.msk.f32.gmra.mrb[2].mxu0 %vm43_vm0, %v18_v13  ;;  %338 = vmatmul.mubr.msk.f32.gmra.mrb[2].mxu1 %vm43_vm0, %v26_v14  ;;  %p370_p3 = por %p369_p2, %p368_p1 }
  0x13   :  { %328 = vmatprep.mubr.msk.f32.mxu0 %vm43_vm0, %v19_v15  ;;  %340 = vmatprep.mubr.msk.f32.mxu1 %vm43_vm0, %v27_v16 }
  0x14   :  { %p371_p4 = pnand %p370_p3, %p364_p0 }
  0x16   :  { %329 = vmatmul.mubr.msk.f32.gmra.mrb[4].mxu0 %vm43_vm0, %v20_v17  ;;  %341 = vmatmul.mubr.msk.f32.gmra.mrb[4].mxu1 %vm43_vm0, %v28_v18 }
  0x17   :  { %331 = vmatprep.mubr.msk.f32.mxu0 %vm43_vm0, %v21_v19  ;;  %343 = vmatprep.mubr.msk.f32.mxu1 %vm43_vm0, %v29_v20 }
  0x1a   :  { %332 = vmatmul.mubr.msk.f32.gmra.mrb[6].mxu0 %vm43_vm0, %v22_v21  ;;  %344 = vmatmul.mubr.msk.f32.gmra.mrb[6].mxu1 %vm43_vm0, %v30_v22 }
  0xe1   :  { %v324_v24 = vpop.f32.mrb[0].mxu0  ;;  %v336_v25 = vpop.f32.mrb[0].mxu1 }
  0xe2   :  { %v168_v26 = vadd.f32 %v324_v24, %v273_v23  ;;  %v208_v27 = vadd.f32 %v336_v25, %v273_v23  ;;  %v162_v28 = vpop.f32.mrb[1].mxu0  ;;  %v202_v29 = vpop.f32.mrb[1].mxu1 }
  0xe3   :  { %v163_v30 = vadd.f32 %v273_v23, %v162_v28  ;;  %v203_v31 = vadd.f32 %v273_v23, %v202_v29 }
  0xe4   :  { %242 = vst [vmem:[#allocation2 + $0x8] sm:$0xff] %v168_v26  ;;  %250 = vst [vmem:[#allocation2 + $0x48] sm:$0xff] %v208_v27 }
  0xe5   :  { %241 = vst [vmem:[#allocation2] sm:$0xff] %v163_v30  ;;  %249 = vst [vmem:[#allocation2 + $0x40] sm:$0xff] %v203_v31  ;;  %v327_v32 = vpop.f32.mrb[2].mxu0  ;;  %v339_v33 = vpop.f32.mrb[2].mxu1 }
  0xe6   :  { %v178_v34 = vadd.f32 %v327_v32, %v273_v23  ;;  %v218_v35 = vadd.f32 %v339_v33, %v273_v23  ;;  %v172_v36 = vpop.f32.mrb[3].mxu0  ;;  %v212_v37 = vpop.f32.mrb[3].mxu1 }
  0xe7   :  { %v173_v38 = vadd.f32 %v273_v23, %v172_v36  ;;  %v213_v39 = vadd.f32 %v273_v23, %v212_v37 }
  0xe8   :  { %244 = vst [vmem:[#allocation2 + $0x18] sm:$0xff] %v178_v34  ;;  %252 = vst [vmem:[#allocation2 + $0x58] sm:$0xff] %v218_v35 }
  0xe9   :  { %243 = vst [vmem:[#allocation2 + $0x10] sm:$0xff] %v173_v38  ;;  %251 = vst [vmem:[#allocation2 + $0x50] sm:$0xff] %v213_v39  ;;  %v330_v40 = vpop.f32.mrb[4].mxu0  ;;  %v342_v41 = vpop.f32.mrb[4].mxu1 }
  0xea   :  { %v188_v42 = vadd.f32 %v330_v40, %v273_v23  ;;  %v228_v43 = vadd.f32 %v342_v41, %v273_v23  ;;  %v182_v44 = vpop.f32.mrb[5].mxu0  ;;  %v222_v45 = vpop.f32.mrb[5].mxu1 }
  0xeb   :  { %v183_v46 = vadd.f32 %v273_v23, %v182_v44  ;;  %v223_v47 = vadd.f32 %v273_v23, %v222_v45 }
  0xec   :  { %246 = vst [vmem:[#allocation2 + $0x28] sm:$0xff] %v188_v42  ;;  %254 = vst [vmem:[#allocation2 + $0x68] sm:$0xff] %v228_v43 }
  0xed   :  { %245 = vst [vmem:[#allocation2 + $0x20] sm:$0xff] %v183_v46  ;;  %253 = vst [vmem:[#allocation2 + $0x60] sm:$0xff] %v223_v47  ;;  %v333_v48 = vpop.f32.mrb[6].mxu0  ;;  %v345_v49 = vpop.f32.mrb[6].mxu1 }
  0xee   :  { %v198_v50 = vadd.f32 %v333_v48, %v273_v23  ;;  %v238_v51 = vadd.f32 %v345_v49, %v273_v23  ;;  %v192_v52 = vpop.f32.mrb[7].mxu0  ;;  %v232_v53 = vpop.f32.mrb[7].mxu1 }
  0xef   :  { %v193_v54 = vadd.f32 %v273_v23, %v192_v52  ;;  %v233_v55 = vadd.f32 %v273_v23, %v232_v53 }
  0xf0   :  { %248 = vst [vmem:[#allocation2 + $0x38] sm:$0xff] %v198_v50  ;;  %256 = vst [vmem:[#allocation2 + $0x78] sm:$0xff] %v238_v51 }
  0xf1   :  { %247 = vst [vmem:[#allocation2 + $0x30] sm:$0xff] %v193_v54  ;;  %255 = vst [vmem:[#allocation2 + $0x70] sm:$0xff] %v233_v55 }
  0xf2   :  { %374 = shalt.err (!%p371_p4)
}
  0xf3   :  { %s375_s4 = scalar_lea.hbm %s507_s3, 2048 }
  0xf4   :  { %p376_p5 = scmp.ne.s32.totalorder %s507_s3, %s375_s4  ;;  %p379_p6 = scmp.lt.u32.totalorder %s375_s4, %s507_s3 }
  0xf6   :  { %p381_p7 = pnand %p379_p6, %p376_p5 }
  0xf8   :  { %384 = shalt.err (!%p381_p7)
}
  0xf9   :  { %s388_s8 = smov 128   ;;  %s389_s9 = smov 8  }
  0xfa   :  { %268 = dma.vmem_to_hbm [thread:$0]  %s263_s2, 2048, %s507_s3, [#allocation3], %s388_s8, %s388_s8, %s389_s9  }
  0xfb   :  { %385 = dma.done.wait [#allocation3], 2048  }
  0xfc   :  { %386 = vsyncadd [#allocation3], 4294965248 }
  0xfd   :  { %272 = vsyncpa [#allocation3], 1 }

</bundles_post_ra>
